<compile_context>
chip_gen: v6e
topology: v6e:2x2x1
jax: 0.10.0
libtpu: 0.0.40
codegen_flags: <defaults>
</compile_context>

<pallas_src>
import jax
import jax.numpy as jnp
from jax.experimental import pallas as pl
from jax.experimental.pallas import tpu as pltpu

EPS = 1e-5


def _hw_budget():
    """Return (vmem_limit_bytes, tile_target_bytes, fused_threshold_bytes)."""
    cap = None
    try:
        info = pltpu.get_tpu_info()
        cap = getattr(info, "vmem_capacity_bytes", None)
    except Exception:
        cap = None
    if cap is None:
        cap = 64 * 1024 * 1024  # conservative default (v7x per-TC VMEM)
    if cap >= 100 * 1024 * 1024:  # v5e / v6e: 128 MiB physical VMEM
        return 64 * 1024 * 1024, 8 * 1024 * 1024, 8 * 1024 * 1024
    # v7x: 64 MiB per TC
    return 40 * 1024 * 1024, 4 * 1024 * 1024, 4 * 1024 * 1024


def _sublane_align(itemsize):
    # f32 -> 8, bf16 -> 16, int8/fp8 -> 32 (match packed-sublane tiling).
    return 8 * max(1, 4 // int(itemsize))


def batch_norm(x, gamma, beta, *, tile_rows=None):
    """x: (B, S, D); gamma, beta: (D,). Returns (B, S, D) normalized like
    nn.BatchNorm1d(d_model) applied over the transposed (B, D, S) layout."""
    B, S, D = x.shape
    N = B * S
    out_dtype = x.dtype
    itemsize = x.dtype.itemsize

    vmem_limit, tile_target, fused_thresh = _hw_budget()
    align = _sublane_align(itemsize)

    # ---- lane-dense folding: pack k = 128//D rows into the 128-lane axis ----
    k = 1
    if D < 128 and 128 % D == 0:
        k = 128 // D
        while k > 1 and N % k != 0:
            k //= 2
    # TODO(synk): D that neither divides 128 nor is a multiple of 128 (e.g. 96,
    # 192) runs with a ragged lane dim (masked stores); could pad D to 128.
    n_eff = N // k
    d_eff = D * k

    x2 = x.reshape(n_eff, d_eff)  # free view (contiguous)
    gamma_f = gamma.astype(jnp.float32)
    beta_f = beta.astype(jnp.float32)
    inv_count = 1.0 / float(N)  # biased variance: divide by N (= B*S)

    f32_bytes = n_eff * d_eff * 4

    # ----------------- fused single-call path (x fits in VMEM) -----------------
    if tile_rows is None and f32_bytes <= fused_thresh:
        gamma_r = jnp.tile(gamma_f.reshape(1, D), (1, k))
        beta_r = jnp.tile(beta_f.reshape(1, D), (1, k))

        def fused_kernel(x_ref, g_ref, b_ref, o_ref):
            xt = x_ref[...].astype(jnp.float32)
            s = jnp.sum(xt, axis=0, keepdims=True)
            q = jnp.sum(xt * xt, axis=0, keepdims=True)
            # Combine the k lane replicas with a log2(k) roll+add butterfly;
            # the result is broadcast back to every replica group.
            sh = D
            while sh < d_eff:
                s = s + pltpu.roll(s, shift=sh, axis=1)
                q = q + pltpu.roll(q, shift=sh, axis=1)
                sh *= 2
            mean = s * inv_count
            var = jnp.maximum(q * inv_count - mean * mean, 0.0)
            inv_std = jax.lax.rsqrt(var + EPS)
            scale = g_ref[...] * inv_std
            shift = b_ref[...] - mean * scale
            o_ref[...] = (xt * scale + shift).astype(o_ref.dtype)

        out2 = pl.pallas_call(
            fused_kernel,
            out_shape=jax.ShapeDtypeStruct((n_eff, d_eff), out_dtype),
            grid_spec=pltpu.PrefetchScalarGridSpec(
                num_scalar_prefetch=0,
                grid=(1,),
                in_specs=[
                    pl.BlockSpec((n_eff, d_eff), lambda i: (0, 0)),
                    pl.BlockSpec((1, d_eff), lambda i: (0, 0)),
                    pl.BlockSpec((1, d_eff), lambda i: (0, 0)),
                ],
                out_specs=pl.BlockSpec((n_eff, d_eff), lambda i: (0, 0)),
            ),
            compiler_params=pltpu.CompilerParams(
                dimension_semantics=("arbitrary",),
                vmem_limit_bytes=vmem_limit,
            ),
        )(x2, gamma_r, beta_r)
        return out2.reshape(B, S, D)

    # ------------------------- streaming two-pass path -------------------------
    if tile_rows is None:
        tn = tile_target // (itemsize * d_eff)
        tn = max(align, (tn // align) * align)
        tn = min(tn, n_eff)
    else:
        tn = min(int(tile_rows), n_eff)
        if tn < n_eff:
            tn = max(align, (tn // align) * align)
            tn = min(tn, n_eff)

    n_tiles = pl.cdiv(n_eff, tn)
    num_split = 2 if n_tiles >= 2 else 1   # two partials -> both v7x TCs
    tpc = pl.cdiv(n_tiles, num_split)      # tiles per core
    any_mask = (n_tiles * tn != n_eff) or (num_split * tpc != n_tiles)
    acc_rows = 8 if tn % 8 == 0 else 1

    # ------------------------------ pass 1: stats ------------------------------
    def stats_kernel(x_ref, psum_ref, psq_ref, sum_sc, sq_sc):
        c = pl.program_id(0)
        j = pl.program_id(1)

        @pl.when(j == 0)
        def _init():
            sum_sc[...] = jnp.zeros_like(sum_sc)
            sq_sc[...] = jnp.zeros_like(sq_sc)

        xt = x_ref[...].astype(jnp.float32)

        def accumulate(xv):
            if acc_rows == 8:
                xv = xv.reshape(tn // 8, 8, d_eff)
                sum_sc[...] += jnp.sum(xv, axis=0)
                sq_sc[...] += jnp.sum(xv * xv, axis=0)
            else:
                sum_sc[...] += jnp.sum(xv, axis=0, keepdims=True)
                sq_sc[...] += jnp.sum(xv * xv, axis=0, keepdims=True)

        if any_mask:
            i_global = c * tpc + j
            tile_is_ragged = (i_global + 1) * tn > n_eff

            @pl.when(jnp.logical_not(tile_is_ragged))
            def _full():
                accumulate(xt)

            @pl.when(tile_is_ragged)
            def _masked():
                rows = (jax.lax.broadcasted_iota(jnp.int32, xt.shape, 0)
                        + i_global * tn)
                accumulate(jnp.where(rows < n_eff, xt, 0.0))
        else:
            accumulate(xt)

        @pl.when(j == tpc - 1)
        def _emit_partial():
            psum_ref[...] = jnp.sum(sum_sc[...], axis=0, keepdims=True)
            psq_ref[...] = jnp.sum(sq_sc[...], axis=0, keepdims=True)

    # Clamp the block index so an over-allocated (fully out-of-range) tile on
    # the second core safely re-reads a valid block; its rows are masked out.
    def x_index(c, j):
        return (jnp.minimum(c * tpc + j, n_tiles - 1), 0)

    psum, psq = pl.pallas_call(
        stats_kernel,
        out_shape=(
            jax.ShapeDtypeStruct((num_split, d_eff), jnp.float32),
            jax.ShapeDtypeStruct((num_split, d_eff), jnp.float32),
        ),
        grid_spec=pltpu.PrefetchScalarGridSpec(
            num_scalar_prefetch=0,
            grid=(num_split, tpc),
            in_specs=[pl.BlockSpec((tn, d_eff), x_index)],
            out_specs=[
                pl.BlockSpec((1, d_eff), lambda c, j: (c, 0)),
                pl.BlockSpec((1, d_eff), lambda c, j: (c, 0)),
            ],
            scratch_shapes=[
                pltpu.VMEM((acc_rows, d_eff), jnp.float32),
                pltpu.VMEM((acc_rows, d_eff), jnp.float32),
            ],
        ),
        compiler_params=pltpu.CompilerParams(
            dimension_semantics=("parallel", "arbitrary"),
            vmem_limit_bytes=vmem_limit,
        ),
    )(x2)

    # -------- tiny finalize in the wrapper (combine partials + replicas) --------
    s = jnp.sum(psum, axis=0).reshape(k, D).sum(axis=0)   # (D,)
    q = jnp.sum(psq, axis=0).reshape(k, D).sum(axis=0)
    mean = s * inv_count
    var = jnp.maximum(q * inv_count - mean * mean, 0.0)   # clamp cancellation
    inv_std = jax.lax.rsqrt(var + EPS)
    scale_d = gamma_f * inv_std
    shift_d = beta_f - mean * scale_d

    # bf16 inputs: keep the apply-pass FMA in bf16 (v6e/v7x have a bf16 VALU).
    # TODO(synk): on v5e (no bf16 VALU) an f32 apply path would be preferable.
    compute_dtype = jnp.bfloat16 if out_dtype == jnp.bfloat16 else jnp.float32
    scale = jnp.tile(scale_d.reshape(1, D), (1, k)).astype(compute_dtype)
    shift = jnp.tile(shift_d.reshape(1, D), (1, k)).astype(compute_dtype)

    # ---------------------------- pass 2: normalize ----------------------------
    def apply_kernel(x_ref, scale_ref, shift_ref, o_ref):
        xv = x_ref[...]
        if xv.dtype != compute_dtype:
            xv = xv.astype(compute_dtype)
        o_ref[...] = (xv * scale_ref[...] + shift_ref[...]).astype(o_ref.dtype)

    out2 = pl.pallas_call(
        apply_kernel,
        out_shape=jax.ShapeDtypeStruct((n_eff, d_eff), out_dtype),
        grid_spec=pltpu.PrefetchScalarGridSpec(
            num_scalar_prefetch=0,
            grid=(n_tiles,),
            in_specs=[
                pl.BlockSpec((tn, d_eff), lambda i: (i, 0)),
                pl.BlockSpec((1, d_eff), lambda i: (0, 0)),
                pl.BlockSpec((1, d_eff), lambda i: (0, 0)),
            ],
            out_specs=pl.BlockSpec((tn, d_eff), lambda i: (i, 0)),
        ),
        compiler_params=pltpu.CompilerParams(
            dimension_semantics=("parallel",),
            vmem_limit_bytes=vmem_limit,
        ),
    )(x2, scale, shift)

    return out2.reshape(B, S, D)


def _reference(x, gamma, beta):
    xf = x.astype(jnp.float32)
    mean = jnp.mean(xf, axis=(0, 1), keepdims=True)
    var = jnp.mean((xf - mean) ** 2, axis=(0, 1), keepdims=True)
    y = (xf - mean) / jnp.sqrt(var + EPS) * gamma.astype(jnp.float32) + beta.astype(jnp.float32)
    return y.astype(x.dtype)


if __name__ == "__main__":
    key = jax.random.PRNGKey(0)
    k0, k1, k2 = jax.random.split(key, 3)

    # Primary shape from the module spec: BatchNorm(seq_len=8, d_model=32), batch=2.
    # Small -> exercises the fused single-call path.
    B, S, D = 2, 8, 32
    x = jax.random.normal(k0, (B, S, D), dtype=jnp.float32)
    gamma = jnp.ones((D,), dtype=jnp.float32)   # nn.BatchNorm1d default weight
    beta = jnp.zeros((D,), dtype=jnp.float32)   # nn.BatchNorm1d default bias

    out = batch_norm(x, gamma, beta)
    jax.block_until_ready(out)
    ref = _reference(x, gamma, beta)
    assert out.shape == x.shape
    assert jnp.allclose(out, ref, atol=1e-5, rtol=1e-5), "small-shape mismatch"

    # Secondary self-check exercising the streaming two-pass path
    # (2-way split stats grid, tail masking, non-trivial affine params).
    B2, S2, D2 = 2, 1000, 32
    x_big = jax.random.normal(k1, (B2, S2, D2), dtype=jnp.float32) * 2.0 + 0.5
    g_big = 1.0 + 0.1 * jax.random.normal(jax.random.PRNGKey(1), (D2,), dtype=jnp.float32)
    b_big = 0.1 * jax.random.normal(jax.random.PRNGKey(2), (D2,), dtype=jnp.float32)
    out_big = batch_norm(x_big, g_big, b_big, tile_rows=128)
    jax.block_until_ready(out_big)
    ref_big = _reference(x_big, g_big, b_big)
    assert jnp.allclose(out_big, ref_big, atol=1e-4, rtol=1e-4), "tiled-path mismatch"

    # Tertiary check: odd number of tiles -> exercises the clamped/fully-masked
    # over-allocated tile on the second partial-sum row.
    B3, S3, D3 = 2, 750, 32
    x_odd = jax.random.normal(k2, (B3, S3, D3), dtype=jnp.float32) - 1.0
    out_odd = batch_norm(x_odd, g_big, b_big, tile_rows=128)
    jax.block_until_ready(out_odd)
    ref_odd = _reference(x_odd, g_big, b_big)
    assert jnp.allclose(out_odd, ref_odd, atol=1e-4, rtol=1e-4), "odd-tile-path mismatch"

    print("KERNEL_OK")
</pallas_src>

<mosaic_0001>
module attributes {stable_mosaic.version = 11 : i64} {
  func.func @fused_kernel(%arg0: i32, %arg1: memref<4x128xf32, #tpu.memory_space<vmem>>, %arg2: memref<1x128xf32, #tpu.memory_space<vmem>>, %arg3: memref<1x128xf32, #tpu.memory_space<vmem>>, %arg4: memref<4x128xf32, #tpu.memory_space<vmem>>) attributes {dimension_semantics = [#tpu.dimension_semantics<arbitrary>], iteration_bounds = array<i64: 1>, scalar_prefetch = 0 : i64, scratch_operands = 0 : i64, tpu.core_type = #tpu.core_type<tc>, window_params = [{pipeline_mode = #tpu.pipeline_mode<synchronous>, transform_indices = @transform_0, window_bounds = array<i64: 4, 128>}, {pipeline_mode = #tpu.pipeline_mode<synchronous>, transform_indices = @transform_1, window_bounds = array<i64: 1, 128>}, {pipeline_mode = #tpu.pipeline_mode<synchronous>, transform_indices = @transform_2, window_bounds = array<i64: 1, 128>}, {pipeline_mode = #tpu.pipeline_mode<synchronous>, transform_indices = @transform_3, window_bounds = array<i64: 4, 128>}]} {
    %c0 = arith.constant 0 : index
    %c0_0 = arith.constant 0 : index
    %0 = vector.load %arg1[%c0, %c0_0] : memref<4x128xf32, #tpu.memory_space<vmem>>, vector<4x128xf32>
    %cst = arith.constant dense<0.000000e+00> : vector<128xf32>
    %1 = vector.multi_reduction <add>, %0, %cst [0] : vector<4x128xf32> to vector<128xf32>
    %2 = vector.shape_cast %1 : vector<128xf32> to vector<1x128xf32>
    %3 = arith.mulf %0, %0 : vector<4x128xf32>
    %cst_1 = arith.constant dense<0.000000e+00> : vector<128xf32>
    %4 = vector.multi_reduction <add>, %3, %cst_1 [0] : vector<4x128xf32> to vector<128xf32>
    %5 = vector.shape_cast %4 : vector<128xf32> to vector<1x128xf32>
    %c32_i32 = arith.constant 32 : i32
    %6 = tpu.dynamic_rotate %2 by %c32_i32 dim 1 : vector<1x128xf32>, i32 -> vector<1x128xf32>
    %7 = arith.addf %2, %6 : vector<1x128xf32>
    %c32_i32_2 = arith.constant 32 : i32
    %8 = tpu.dynamic_rotate %5 by %c32_i32_2 dim 1 : vector<1x128xf32>, i32 -> vector<1x128xf32>
    %9 = arith.addf %5, %8 : vector<1x128xf32>
    %c64_i32 = arith.constant 64 : i32
    %10 = tpu.dynamic_rotate %7 by %c64_i32 dim 1 : vector<1x128xf32>, i32 -> vector<1x128xf32>
    %11 = arith.addf %7, %10 : vector<1x128xf32>
    %c64_i32_3 = arith.constant 64 : i32
    %12 = tpu.dynamic_rotate %9 by %c64_i32_3 dim 1 : vector<1x128xf32>, i32 -> vector<1x128xf32>
    %13 = arith.addf %9, %12 : vector<1x128xf32>
    %cst_4 = arith.constant 6.250000e-02 : f32
    %14 = vector.broadcast %cst_4 : f32 to vector<1x128xf32>
    %15 = arith.mulf %11, %14 : vector<1x128xf32>
    %cst_5 = arith.constant 6.250000e-02 : f32
    %16 = vector.broadcast %cst_5 : f32 to vector<1x128xf32>
    %17 = arith.mulf %13, %16 : vector<1x128xf32>
    %18 = arith.mulf %15, %15 : vector<1x128xf32>
    %19 = arith.subf %17, %18 : vector<1x128xf32>
    %cst_6 = arith.constant 0.000000e+00 : f32
    %20 = vector.broadcast %cst_6 : f32 to vector<1x128xf32>
    %21 = arith.maximumf %19, %20 : vector<1x128xf32>
    %cst_7 = arith.constant 9.99999974E-6 : f32
    %22 = vector.broadcast %cst_7 : f32 to vector<1x128xf32>
    %23 = arith.addf %21, %22 : vector<1x128xf32>
    %24 = math.rsqrt %23 : vector<1x128xf32>
    %c0_8 = arith.constant 0 : index
    %c0_9 = arith.constant 0 : index
    %25 = vector.load %arg2[%c0_8, %c0_9] : memref<1x128xf32, #tpu.memory_space<vmem>>, vector<1x128xf32>
    %26 = arith.mulf %25, %24 : vector<1x128xf32>
    %c0_10 = arith.constant 0 : index
    %c0_11 = arith.constant 0 : index
    %27 = vector.load %arg3[%c0_10, %c0_11] : memref<1x128xf32, #tpu.memory_space<vmem>>, vector<1x128xf32>
    %28 = arith.mulf %15, %26 : vector<1x128xf32>
    %29 = arith.subf %27, %28 : vector<1x128xf32>
    %30 = vector.broadcast %26 : vector<1x128xf32> to vector<4x128xf32>
    %31 = arith.mulf %0, %30 : vector<4x128xf32>
    %32 = vector.broadcast %29 : vector<1x128xf32> to vector<4x128xf32>
    %33 = arith.addf %31, %32 : vector<4x128xf32>
    %c0_12 = arith.constant 0 : index
    %c0_13 = arith.constant 0 : index
    %34 = vector.load %arg4[%c0_12, %c0_13] : memref<4x128xf32, #tpu.memory_space<vmem>>, vector<4x128xf32>
    tpu.vector_store %arg4[%c0_12, %c0_13], %33 {strides = array<i32>} : memref<4x128xf32, #tpu.memory_space<vmem>>, vector<4x128xf32>,
    return
  }
  func.func @transform_0(%arg0: i32) -> (i32, i32) {
    %c0_i32 = arith.constant 0 : i32
    %c0_i32_0 = arith.constant 0 : i32
    %c0_i32_1 = arith.constant 0 : i32
    return %c0_i32, %c0_i32_0 : i32, i32
  }
  func.func @transform_1(%arg0: i32) -> (i32, i32) {
    %c0_i32 = arith.constant 0 : i32
    %c0_i32_0 = arith.constant 0 : i32
    %c0_i32_1 = arith.constant 0 : i32
    return %c0_i32, %c0_i32_0 : i32, i32
  }
  func.func @transform_2(%arg0: i32) -> (i32, i32) {
    %c0_i32 = arith.constant 0 : i32
    %c0_i32_0 = arith.constant 0 : i32
    %c0_i32_1 = arith.constant 0 : i32
    return %c0_i32, %c0_i32_0 : i32, i32
  }
  func.func @transform_3(%arg0: i32) -> (i32, i32) {
    %c0_i32 = arith.constant 0 : i32
    %c0_i32_0 = arith.constant 0 : i32
    %c0_i32_1 = arith.constant 0 : i32
    return %c0_i32, %c0_i32_0 : i32, i32
  }
}

</mosaic_0001>

<bundles_post_ra>
// kernel: tpu_custom_call.1
= control target key start
LH: loop header
LB: loop body
LE: loop exit
PB: predicated region body
PF: predicated region fallthrough
CT: control target
= control target key end

     0   :  { %8 = vsyncpa [#allocation3], 0  ;;  %s184_s0 = inlined_call_operand.hbm [shape: f32[4,128], index: 0, kind: input, shape index: {}]   ;;  %s185_s1 = inlined_call_operand.vmem [shape: f32[1,128], index: 1, kind: input, shape index: {}]   ;;  %s186_s2 = inlined_call_operand.vmem [shape: f32[1,128], index: 2, kind: input, shape index: {}]   ;;  %s187_s3 = inlined_call_operand.hbm [shape: f32[4,128], index: 3, kind: output, shape index: {}]  }
   0x1   :  { %9 = vsyncpa [#allocation4], 0  ;;  %s148_s12 = smov [#allocation2]  }
   0x2   :  { %s16_s13 = sshll.u32 %s148_s12, 4  ;;  %s17_s13 = int_to_ptr.vmem [resolvable:$true] %s16_s13 }
   0x3   :  { %s112_s14 = scalar_lea.vmem %s17_s13, 64  ;;  %p117_p1 = scmp.lt.s32.totalorder %s17_s13, %s17_s13 }
   0x4   :  { %p113_p0 = scmp.ne.s32.totalorder %s17_s13, %s112_s14  ;;  %p118_p2 = scmp.lt.s32.totalorder %s112_s14, %s112_s14 }
   0x6   :  { %p119_p3 = por %p118_p2, %p117_p1 }
   0x8   :  { %p120_p4 = pnand %p119_p3, %p113_p0 }
   0xa   :  { %123 = shalt.err (!%p120_p4)
}
   0xb   :  { %19 = dma.hbm_to_vmem [thread:$0]  %s184_s0, 64, %s17_s13, [#allocation3]  }
   0xc   :  { %144 = dma.done.wait [#allocation3], 64  }
   0xd   :  { %145 = vsyncadd [#allocation3], 4294967232  ;;  %vm28_vm0 = vcmask 1043456   ;;  %v27_v0 = vld [vmem:[#allocation2] sm:$0xf]  ;;  %s149_s17 = smov 32   ;;  %v69_v30 = vlaneseq }
   0xe   :  { %v29_v1 = vsel %vm28_vm0, %v27_v0, 0.0  ;;  %v36_v2 = vmul.f32 %v27_v0, %v27_v0  ;;  %s150_s0 = smov 64   ;;  %v63_v32 = vld [vmem:[%s185_s1] sm:$0x1]  ;;  %s151_s22 = smov [#allocation5]  }
   0xf   :  { %v30_v3 = vrot.slane %v29_v1, 4  ;;  %v70_v31 = vshrl.u32 %v69_v30, 7  ;;  %v65_v36 = vld [vmem:[%s186_s2] sm:$0x1]  ;;  %s89_s23 = sshll.u32 %s151_s22, 4  ;;  %s90_s23 = int_to_ptr.vmem [resolvable:$true] %s89_s23 }
  0x10   :  { %v37_v4 = vsel %vm28_vm0, %v36_v2, 0.0  ;;  %s124_s24 = scalar_lea.vmem %s90_s23, 64  ;;  %p129_p6 = scmp.lt.s32.totalorder %s90_s23, %s90_s23 }
  0x11   :  { %v31_v5 = vadd.f32 %v30_v3, %v29_v1  ;;  %v38_v6 = vrot.slane %v37_v4, 4  ;;  %v71_v33 = vsub.s32 0, %v70_v31  ;;  %p125_p5 = scmp.ne.s32.totalorder %s90_s23, %s124_s24  ;;  %p130_p7 = scmp.lt.s32.totalorder %s124_s24, %s124_s24 }
  0x13   :  { %v32_v7 = vrot.slane %v31_v5, 2  ;;  %v39_v8 = vadd.f32 %v38_v6, %v37_v4  ;;  %p131_p8 = por %p130_p7, %p129_p6 }
  0x15   :  { %v33_v9 = vadd.f32 %v32_v7, %v31_v5  ;;  %v40_v10 = vrot.slane %v39_v8, 2  ;;  %p132_p9 = pnand %p131_p8, %p125_p5 }
  0x17   :  { %v34_v11 = vrot.slane %v33_v9, 1  ;;  %v41_v12 = vadd.f32 %v40_v10, %v39_v8 }
  0x19   :  { %v35_v13 = vadd.f32 %v34_v11, %v33_v9  ;;  %v42_v14 = vrot.slane %v41_v12, 1 }
  0x1b   :  { %44 = vrot.lane.b32.xlu0 %v35_v13, %s149_s17  ;;  %v43_v15 = vadd.f32 %v42_v14, %v41_v12 }
  0x1f   :  { %47 = vrot.lane.b32.xlu0 %v43_v15, %s149_s17 }
  0x8d   :  { %v45_v16 = vpop.permute.xlu0 %44 }
  0x8e   :  { %v46_v17 = vadd.f32 %v45_v16, %v35_v13 }
  0x90   :  { %50 = vrot.lane.b32.xlu1 %v46_v17, %s150_s0 }
  0x91   :  { %v48_v18 = vpop.permute.xlu0 %47 }
  0x92   :  { %v49_v19 = vadd.f32 %v48_v18, %v43_v15 }
  0x94   :  { %53 = vrot.lane.b32.xlu1 %v49_v19, %s150_s0 }
 0x102   :  { %v51_v20 = vpop.permute.xlu1 %50 }
 0x103   :  { %v52_v21 = vadd.f32 %v51_v20, %v46_v17 }
 0x105   :  { %v56_v22 = vmul.f32 0.0625, %v52_v21 }
 0x106   :  { %v54_v23 = vpop.permute.xlu1 %53 }
 0x107   :  { %v55_v24 = vadd.f32 %v54_v23, %v49_v19  ;;  %v58_v25 = vmul.f32 %v56_v22, %v56_v22 }
 0x109   :  { %v57_v26 = vmul.f32 0.0625, %v55_v24 }
 0x10b   :  { %v59_v27 = vsub.f32 %v57_v26, %v58_v25 }
 0x10d   :  { %v60_v28 = vmax.f32 %v59_v27, 0.0 }
 0x10f   :  { %v61_v29 = vadd.f32 1e-05, %v60_v28 }
 0x111   :  { %102 = vrsqrt.f32 %v61_v29 }
 0x11e   :  { %v103_v34 = vpop.eup %102 }
 0x11f   :  { %v64_v35 = vmul.f32 %v103_v34, %v63_v32 }
 0x121   :  { %v66_v37 = vmul.f32 %v64_v35, %v56_v22  ;;  %v72_v38 = vrot.slane %v64_v35, %v71_v33 }
 0x123   :  { %v67_v39 = vsub.f32 %v65_v36, %v66_v37  ;;  %v74_v40 = vmul.f32 %v72_v38, %v27_v0 }
 0x125   :  { %v79_v41 = vrot.slane %v67_v39, %v71_v33 }
 0x127   :  { %v81_v42 = vadd.f32 %v79_v41, %v74_v40 }
 0x129   :  { %82 = vst [vmem:[#allocation5] sm:$0xf] %v81_v42 }
 0x12a   :  { %135 = shalt.err (!%p132_p9)
}
 0x12b   :  { %92 = dma.vmem_to_hbm [thread:$0]  %s90_s23, 64, %s187_s3, [#allocation4]  }
 0x12c   :  { %146 = dma.done.wait [#allocation4], 64  }
 0x12d   :  { %147 = vsyncadd [#allocation4], 4294967232 }
 0x12e   :  { %96 = vsyncpa [#allocation3], 1 }
 0x12f   :  { %97 = vsyncpa [#allocation4], 1 }

</bundles_post_ra>
